<compile_context>
chip_gen: v7x
topology: tpu7x:2x2x1
jax: 0.10.0
libtpu: 0.0.40
codegen_flags: <defaults>
</compile_context>

<pallas_src>
import functools

import jax
import jax.numpy as jnp
from jax.experimental import pallas as pl
from jax.experimental.pallas import tpu as pltpu

LANE = 128  # padded hidden width and packed-output slab width


def mlp_kernel(x_ref, w1_ref, b1_ref, w23_ref, b23_ref, out_ref, *, action_dim):
    A = action_dim
    x = x_ref[...]                                                      # [B, S]

    # fc1 (hidden padded to 128 lanes with zero weights/bias) + ReLU
    h = jnp.dot(x, w1_ref[...], preferred_element_type=jnp.float32) + b1_ref[...]
    h = jnp.maximum(h, 0.0)                                             # [B, 128]

    # Fused fc2 + fc3 in a single MXU push:
    #   cols 0..A-1 of f = action logits `a`, col 2A of f = value `v`,
    #   all other lanes are exactly zero (zero-padded weights & biases).
    f = jnp.dot(h, w23_ref[...], preferred_element_type=jnp.float32) + b23_ref[...]

    # log_softmax over the action axis (cols 0..A-1), numerically stable
    a = f[:, :A]                                                        # [B, A]
    m = jnp.max(a, axis=-1, keepdims=True)
    s = a - m
    lse = jnp.log(jnp.sum(jnp.exp(s), axis=-1, keepdims=True))
    logp = s - lse                                                      # [B, A]

    # Lane-dense packed output slab [B, 128]: [ a | log_probs | v | 0 ... ]
    out_ref[...] = f                 # a in cols 0..A-1, v at col 2A, zeros elsewhere
    out_ref[:, A:2 * A] = logp       # fill log_probs into cols A..2A-1


def pack_params(params):
    """Zero-pad / fuse raw Linear params into lane-dense kernel operands."""
    w1, b1 = params["w1"], params["b1"]           # [S, H], [1, H]
    w2, b2 = params["w2"], params["b2"]           # [H, A], [1, A]
    w3, b3 = params["w3"], params["b3"]           # [H, 1], [1, 1]
    S, H = w1.shape
    A = w2.shape[1]
    assert 2 * A + 1 <= LANE, "packed slab must fit logits|log_probs|value"

    w1p = jnp.zeros((S, LANE), jnp.float32).at[:, :H].set(w1)
    b1p = jnp.zeros((1, LANE), jnp.float32).at[:, :H].set(b1)

    w23p = jnp.zeros((LANE, LANE), jnp.float32)
    w23p = w23p.at[:H, :A].set(w2).at[:H, 2 * A].set(w3[:, 0])
    b23p = jnp.zeros((1, LANE), jnp.float32)
    b23p = b23p.at[:, :A].set(b2).at[0, 2 * A].set(b3[0, 0])

    return {"w1p": w1p, "b1p": b1p, "w23p": w23p, "b23p": b23p, "action_dim": A}


def mlp_forward(x, packed):
    """x: [B, state_dim] f32. packed: output of pack_params."""
    B, _ = x.shape
    A = packed["action_dim"]

    vmem = pl.BlockSpec(memory_space=pltpu.MemorySpace.VMEM)
    slab = pl.pallas_call(
        functools.partial(mlp_kernel, action_dim=A),
        out_shape=jax.ShapeDtypeStruct((B, LANE), jnp.float32),
        in_specs=[vmem, vmem, vmem, vmem, vmem],
        out_specs=vmem,
    )(x, packed["w1p"], packed["b1p"], packed["w23p"], packed["b23p"])

    a = slab[:, :A]
    logp = slab[:, A:2 * A]
    v = slab[:, 2 * A:2 * A + 1]
    # Categorical(logits=logp) entropy; logp already normalized. Trivial
    # reduction done outside the kernel (fuses into the surrounding XLA graph).
    entropy = jnp.mean(-jnp.sum(jnp.exp(logp) * logp, axis=1))
    # TODO(synk): torch.distributions.Categorical object has no array
    # equivalent; it is fully determined by `log_probs` returned here.
    return {"a": a, "log_probs": logp, "v": v, "entropy": entropy}


def init_params(key, state_dim, action_dim, hidden=64):
    """Deterministic init mimicking nn.Linear (uniform +-1/sqrt(fan_in))."""
    ks = jax.random.split(key, 6)

    def linear(kw, kb, fan_in, fan_out):
        bound = 1.0 / jnp.sqrt(jnp.float32(fan_in))
        w = jax.random.uniform(kw, (fan_in, fan_out), jnp.float32, -bound, bound)
        b = jax.random.uniform(kb, (1, fan_out), jnp.float32, -bound, bound)
        return w, b

    w1, b1 = linear(ks[0], ks[1], state_dim, hidden)
    w2, b2 = linear(ks[2], ks[3], hidden, action_dim)
    w3, b3 = linear(ks[4], ks[5], hidden, 1)
    return {"w1": w1, "b1": b1, "w2": w2, "b2": b2, "w3": w3, "b3": b3}


def reference_forward(x, p):
    h = jnp.maximum(x @ p["w1"] + p["b1"], 0.0)
    a = h @ p["w2"] + p["b2"]
    v = h @ p["w3"] + p["b3"]
    logp = jax.nn.log_softmax(a, axis=1)
    ent = jnp.mean(-jnp.sum(jnp.exp(logp) * logp, axis=1))
    return a, logp, v, ent


if __name__ == "__main__":
    B, STATE_DIM, ACTION_DIM = 8, 32, 8

    key = jax.random.PRNGKey(0)
    kx, kp = jax.random.split(key)
    x = jax.random.normal(kx, (B, STATE_DIM), dtype=jnp.float32)
    params = init_params(kp, STATE_DIM, ACTION_DIM)
    packed = pack_params(params)

    out = mlp_forward(x, packed)
    jax.block_until_ready(out)

    # sanity check against pure-JAX reference
    a_ref, logp_ref, v_ref, ent_ref = reference_forward(x, params)
    assert jnp.allclose(out["a"], a_ref, atol=1e-4)
    assert jnp.allclose(out["log_probs"], logp_ref, atol=1e-4)
    assert jnp.allclose(out["v"], v_ref, atol=1e-4)
    assert jnp.allclose(out["entropy"], ent_ref, atol=1e-4)

    print("KERNEL_OK")
</pallas_src>

<mosaic_0001>
module attributes {stable_mosaic.version = 11 : i64} {
  func.func @mlp_kernel(%arg0: memref<8x32xf32, #tpu.memory_space<vmem>>, %arg1: memref<32x128xf32, #tpu.memory_space<vmem>>, %arg2: memref<1x128xf32, #tpu.memory_space<vmem>>, %arg3: memref<128x128xf32, #tpu.memory_space<vmem>>, %arg4: memref<1x128xf32, #tpu.memory_space<vmem>>, %arg5: memref<8x128xf32, #tpu.memory_space<vmem>>) attributes {dimension_semantics = [], scalar_prefetch = 0 : i64, scratch_operands = 0 : i64, tpu.core_type = #tpu.core_type<tc>} {
    %c0 = arith.constant 0 : index
    %c0_0 = arith.constant 0 : index
    %0 = vector.load %arg0[%c0, %c0_0] : memref<8x32xf32, #tpu.memory_space<vmem>>, vector<8x32xf32>
    %c0_1 = arith.constant 0 : index
    %c0_2 = arith.constant 0 : index
    %1 = vector.load %arg1[%c0_1, %c0_2] : memref<32x128xf32, #tpu.memory_space<vmem>>, vector<32x128xf32>
    %cst = arith.constant dense<0.000000e+00> : vector<8x128xf32>
    %2 = tpu.matmul %0, %1, %cst {dimension_numbers = #tpu.dot_dimension_numbers<[1], [0], [0], [1], [0, 0, 1, 1], [], []>} : vector<8x32xf32>, vector<32x128xf32>, vector<8x128xf32> -> vector<8x128xf32>
    %c0_3 = arith.constant 0 : index
    %c0_4 = arith.constant 0 : index
    %3 = vector.load %arg2[%c0_3, %c0_4] : memref<1x128xf32, #tpu.memory_space<vmem>>, vector<1x128xf32>
    %4 = vector.broadcast %3 : vector<1x128xf32> to vector<8x128xf32>
    %5 = arith.addf %2, %4 : vector<8x128xf32>
    %cst_5 = arith.constant 0.000000e+00 : f32
    %6 = vector.broadcast %cst_5 : f32 to vector<8x128xf32>
    %7 = arith.maximumf %5, %6 : vector<8x128xf32>
    %c0_6 = arith.constant 0 : index
    %c0_7 = arith.constant 0 : index
    %8 = vector.load %arg3[%c0_6, %c0_7] : memref<128x128xf32, #tpu.memory_space<vmem>>, vector<128x128xf32>
    %cst_8 = arith.constant dense<0.000000e+00> : vector<8x128xf32>
    %9 = tpu.matmul %7, %8, %cst_8 {dimension_numbers = #tpu.dot_dimension_numbers<[1], [0], [0], [1], [0, 0, 1, 1], [], []>} : vector<8x128xf32>, vector<128x128xf32>, vector<8x128xf32> -> vector<8x128xf32>
    %c0_9 = arith.constant 0 : index
    %c0_10 = arith.constant 0 : index
    %10 = vector.load %arg4[%c0_9, %c0_10] : memref<1x128xf32, #tpu.memory_space<vmem>>, vector<1x128xf32>
    %11 = vector.broadcast %10 : vector<1x128xf32> to vector<8x128xf32>
    %12 = arith.addf %9, %11 : vector<8x128xf32>
    %13 = vector.extract_strided_slice %12 {offsets = [0, 0], sizes = [8, 8], strides = [1, 1]} : vector<8x128xf32> to vector<8x8xf32>
    %cst_11 = arith.constant dense<0xFF800000> : vector<8xf32>
    %14 = vector.multi_reduction <maximumf>, %13, %cst_11 [1] : vector<8x8xf32> to vector<8xf32>
    %15 = vector.shape_cast %14 : vector<8xf32> to vector<8x1xf32>
    %16 = vector.broadcast %15 : vector<8x1xf32> to vector<8x8xf32>
    %17 = arith.subf %13, %16 : vector<8x8xf32>
    %18 = math.exp %17 : vector<8x8xf32>
    %cst_12 = arith.constant dense<0.000000e+00> : vector<8xf32>
    %19 = vector.multi_reduction <add>, %18, %cst_12 [1] : vector<8x8xf32> to vector<8xf32>
    %20 = vector.shape_cast %19 : vector<8xf32> to vector<8x1xf32>
    %21 = math.log %20 : vector<8x1xf32>
    %22 = vector.broadcast %21 : vector<8x1xf32> to vector<8x8xf32>
    %23 = arith.subf %17, %22 : vector<8x8xf32>
    %c0_13 = arith.constant 0 : index
    %c0_14 = arith.constant 0 : index
    %24 = vector.load %arg5[%c0_13, %c0_14] : memref<8x128xf32, #tpu.memory_space<vmem>>, vector<8x128xf32>
    tpu.vector_store %arg5[%c0_13, %c0_14], %12 {strides = array<i32>} : memref<8x128xf32, #tpu.memory_space<vmem>>, vector<8x128xf32>,
    %c0_15 = arith.constant 0 : index
    %c8 = arith.constant 8 : index
    %25 = vector.load %arg5[%c0_15, %c8] : memref<8x128xf32, #tpu.memory_space<vmem>>, vector<8x8xf32>
    tpu.vector_store %arg5[%c0_15, %c8], %23 {strides = array<i32>} : memref<8x128xf32, #tpu.memory_space<vmem>>, vector<8x8xf32>,
    return
  }
}

</mosaic_0001>

<bundles_post_ra>
// kernel: tpu_custom_call.1
= control target key start
LH: loop header
LB: loop body
LE: loop exit
PB: predicated region body
PF: predicated region fallthrough
CT: control target
= control target key end

     0   :  { %10 = vsyncpa [#allocation3], 0  ;;  %s584_s0 = inlined_call_operand.hbm [shape: f32[8,32], index: 0, kind: input, shape index: {}]   ;;  %s585_s1 = inlined_call_operand.hbm [shape: f32[32,128], index: 1, kind: input, shape index: {}]   ;;  %s586_s2 = inlined_call_operand.vmem [shape: f32[1,128], index: 2, kind: input, shape index: {}]   ;;  %s587_s3 = inlined_call_operand.hbm [shape: f32[128,128], index: 3, kind: input, shape index: {}]   ;;  %s588_s4 = inlined_call_operand.vmem [shape: f32[1,128], index: 4, kind: input, shape index: {}]   ;;  %s589_s5 = inlined_call_operand.hbm [shape: f32[8,128], index: 5, kind: output, shape index: {}]  }
   0x1   :  { %11 = vsyncpa [#allocation6], 0 }
   0x2   :  { %12 = vsyncpa [#allocation4], 0  ;;  %s484_s18 = smov [#allocation5]   ;;  %s390_s22 = scalar_lea.hbm %s585_s1, 512 }
   0x3   :  { %s28_s19 = sshll.u32 %s484_s18, 4  ;;  %p391_p0 = scmp.ne.s32.totalorder %s585_s1, %s390_s22  ;;  %s29_s19 = int_to_ptr.vmem [resolvable:$true] %s28_s19 }
   0x4   :  { %p394_p1 = scmp.lt.u32.totalorder %s390_s22, %s585_s1 }
   0x6   :  { %p396_p2 = pnand %p394_p1, %p391_p0 }
   0x8   :  { %399 = shalt.err (!%p396_p2)
}
   0x9   :  { %s400_s27 = scalar_lea.vmem %s29_s19, 512  ;;  %p405_p4 = scmp.lt.s32.totalorder %s29_s19, %s29_s19 }
   0xa   :  { %p401_p3 = scmp.ne.s32.totalorder %s29_s19, %s400_s27  ;;  %p406_p5 = scmp.lt.s32.totalorder %s400_s27, %s400_s27 }
   0xc   :  { %p407_p6 = por %p406_p5, %p405_p4 }
   0xe   :  { %p408_p7 = pnand %p407_p6, %p401_p3 }
  0x10   :  { %411 = shalt.err (!%p408_p7)
}
  0x11   :  { %s485_s28 = smov 128   ;;  %s486_s29 = smov 8  }
  0x12   :  { %34 = dma.hbm_to_vmem [thread:$0]  %s585_s1, 512, %s29_s19, [#allocation6], %s485_s28, %s485_s28, %s486_s29  }
  0x13   :  { %s487_s7 = smov [#allocation2]   ;;  %s488_s9 = smov [#allocation7]  }
  0x14   :  { %s19_s8 = sshll.u32 %s487_s7, 4  ;;  %s42_s10 = sshll.u32 %s488_s9, 4  ;;  %s20_s8 = int_to_ptr.vmem [resolvable:$true] %s19_s8  ;;  %s43_s10 = int_to_ptr.vmem [resolvable:$true] %s42_s10 }
  0x15   :  { %s412_s13 = scalar_lea.hbm %s584_s0, 128 }
  0x16   :  { %p413_p8 = scmp.ne.s32.totalorder %s584_s0, %s412_s13  ;;  %p416_p9 = scmp.lt.u32.totalorder %s412_s13, %s584_s0 }
  0x18   :  { %p418_p10 = pnand %p416_p9, %p413_p8 }
  0x1a   :  { %421 = shalt.err (!%p418_p10)
}
  0x1b   :  { %s422_s1 = scalar_lea.vmem %s20_s8, 128  ;;  %p427_p12 = scmp.lt.s32.totalorder %s20_s8, %s20_s8 }
  0x1c   :  { %p423_p11 = scmp.ne.s32.totalorder %s20_s8, %s422_s1  ;;  %p428_p13 = scmp.lt.s32.totalorder %s422_s1, %s422_s1 }
  0x1e   :  { %p429_p0 = por %p428_p13, %p427_p12 }
  0x20   :  { %p430_p1 = pnand %p429_p0, %p423_p11 }
  0x22   :  { %433 = shalt.err (!%p430_p1)
}
  0x23   :  { %22 = dma.hbm_to_vmem [thread:$0]  %s584_s0, 128, %s20_s8, [#allocation3]  }
  0x24   :  { %s434_s22 = scalar_lea.hbm %s587_s3, 2048 }
  0x25   :  { %p435_p2 = scmp.ne.s32.totalorder %s587_s3, %s434_s22  ;;  %p438_p3 = scmp.lt.u32.totalorder %s434_s22, %s587_s3 }
  0x27   :  { %p440_p4 = pnand %p438_p3, %p435_p2 }
  0x29   :  { %443 = shalt.err (!%p440_p4)
}
  0x2a   :  { %s444_s27 = scalar_lea.vmem %s43_s10, 2048  ;;  %p449_p6 = scmp.lt.s32.totalorder %s43_s10, %s43_s10 }
  0x2b   :  { %p445_p5 = scmp.ne.s32.totalorder %s43_s10, %s444_s27  ;;  %p450_p7 = scmp.lt.s32.totalorder %s444_s27, %s444_s27 }
  0x2d   :  { %p451_p8 = por %p450_p7, %p449_p6 }
  0x2f   :  { %p452_p9 = pnand %p451_p8, %p445_p5 }
  0x31   :  { %455 = shalt.err (!%p452_p9)
}
  0x32   :  { %48 = dma.hbm_to_vmem [thread:$0]  %s587_s3, 2048, %s43_s10, [#allocation6], %s485_s28, %s485_s28, %s486_s29  }
  0x33   :  { %478 = dma.done.wait [#allocation3], 128  }
  0x34   :  { %479 = vsyncadd [#allocation3], 4294967168 }
  0x35   :  { %480 = dma.done.wait [#allocation6], 2560  }
  0x36   :  { %481 = vsyncadd [#allocation6], 4294964736  ;;  %v489_v0 = vmov 0.0|0.0   ;;  %vm490_vm0 = vmmov 0   ;;  %v491_v1 = vmov 0.0   ;;  %v61_v2 = vld [vmem:[#allocation5] sm:$0xff] }
  0x37   :  { %347 = vmatprep.subr.bf16.mxu0 %v489_v0  ;;  %309 = vmatprep.mubr.msk.f32.mxu0 %vm490_vm0, %v491_v1  ;;  %v62_v3 = vld [vmem:[#allocation5 + $0x8] sm:$0xff]  ;;  %v63_v4 = vld [vmem:[#allocation5 + $0x10] sm:$0xff]  ;;  %v64_v6 = vld [vmem:[#allocation5 + $0x18] sm:$0xff]  ;;  %vm72_vm1 = vcmask 261120   ;;  %vm240_vm2 = vcmask 64512   ;;  %vm258_vm3 = vcmask 130112  }
  0x38   :  { %353 = vmatprep.subr.bf16.mxu1 %v489_v0  ;;  %344 = vmatprep.mubr.msk.f32.mxu1 %vm490_vm0, %v491_v1  ;;  %v348_v5 = vpack.c.bf16 %v62_v3, %v61_v2  ;;  %v147_v7 = vld [vmem:[#allocation7] sm:$0xff]  ;;  %v148_v8 = vld [vmem:[#allocation7 + $0x8] sm:$0xff]  ;;  %v149_v9 = vld [vmem:[#allocation7 + $0x10] sm:$0xff]  ;;  %v351_v11 = vpack.c.bf16 %v64_v6, %v63_v4 }
  0x39   :  { %v150_v10 = vld [vmem:[#allocation7 + $0x18] sm:$0xff]  ;;  %v354_v12 = vpack.c.bf16 %v148_v8, %v147_v7  ;;  %v151_v14 = vld [vmem:[#allocation7 + $0x20] sm:$0xff]  ;;  %v152_v15 = vld [vmem:[#allocation7 + $0x28] sm:$0xff] }
  0x3a   :  { %349 = vmatpush3.bf16.msra.mxu0 %v348_v5  ;;  %v357_v13 = vpack.c.bf16 %v150_v10, %v149_v9  ;;  %v60_v16 = vld [vmem:[#allocation2] sm:$0xff]  ;;  %v360_v17 = vpack.c.bf16 %v152_v15, %v151_v14  ;;  %v153_v18 = vld [vmem:[#allocation7 + $0x30] sm:$0xff]  ;;  %v155_v21 = vld [vmem:[#allocation7 + $0x40] sm:$0xff] }
  0x3b   :  { %350 = vmatprep.subr.bf16.mxu0 %v489_v0  ;;  %355 = vmatpush3.bf16.msra.mxu1 %v354_v12  ;;  %v154_v19 = vld [vmem:[#allocation7 + $0x38] sm:$0xff]  ;;  %v156_v22 = vld [vmem:[#allocation7 + $0x48] sm:$0xff]  ;;  %v157_v24 = vld [vmem:[#allocation7 + $0x50] sm:$0xff] }
  0x3c   :  { %356 = vmatprep.subr.bf16.mxu1 %v489_v0  ;;  %v363_v20 = vpack.c.bf16 %v154_v19, %v153_v18  ;;  %v366_v23 = vpack.c.bf16 %v156_v22, %v155_v21  ;;  %v158_v25 = vld [vmem:[#allocation7 + $0x58] sm:$0xff]  ;;  %v159_v27 = vld [vmem:[#allocation7 + $0x60] sm:$0xff]  ;;  %v160_v28 = vld [vmem:[#allocation7 + $0x68] sm:$0xff] }
  0x3d   :  { %v369_v26 = vpack.c.bf16 %v158_v25, %v157_v24  ;;  %v372_v29 = vpack.c.bf16 %v160_v28, %v159_v27  ;;  %v161_v30 = vld [vmem:[#allocation7 + $0x70] sm:$0xff]  ;;  %v162_v31 = vld [vmem:[#allocation7 + $0x78] sm:$0xff] }
  0x3e   :  { %352 = vmatpush3.bf16.msra.mxu0 %v351_v11  ;;  %v375_v32 = vpack.c.bf16 %v162_v31, %v161_v30  ;;  %v276_v33 = vld [vmem:[%s586_s2] ss:$0 sm:$0xff]  ;;  %s492_s2 = smov [#allocation8]  }
  0x3f   :  { %358 = vmatpush3.bf16.msra.mxu1 %v357_v13  ;;  %v278_v38 = vld [vmem:[%s588_s4] ss:$0 sm:$0xff]  ;;  %s266_s4 = sshll.u32 %s492_s2, 4  ;;  %s267_s4 = int_to_ptr.vmem [resolvable:$true] %s266_s4 }
  0x40   :  { %359 = vmatprep.subr.bf16.mxu1 %v489_v0  ;;  %s456_s8 = scalar_lea.vmem %s267_s4, 128  ;;  %p461_p11 = scmp.lt.s32.totalorder %s267_s4, %s267_s4 }
  0x41   :  { %310 = vmatmul.mubr.msk.f32.vlgmr.msra.gmra.mrb[0].mxu0 %vm72_vm1, %v60_v16  ;;  %p457_p10 = scmp.ne.s32.totalorder %s267_s4, %s456_s8  ;;  %p462_p12 = scmp.lt.s32.totalorder %s456_s8, %s456_s8 }
  0x43   :  { %361 = vmatpush3.bf16.msra.mxu1 %v360_v17  ;;  %p463_p13 = por %p462_p12, %p461_p11 }
  0x44   :  { %362 = vmatprep.subr.bf16.mxu1 %v489_v0 }
  0x45   :  { %p464_p0 = pnand %p463_p13, %p457_p10 }
  0x47   :  { %364 = vmatpush3.bf16.msra.mxu1 %v363_v20 }
  0x48   :  { %365 = vmatprep.subr.bf16.mxu1 %v489_v0 }
  0x4b   :  { %367 = vmatpush3.bf16.msra.mxu1 %v366_v23 }
  0x4c   :  { %368 = vmatprep.subr.bf16.mxu1 %v489_v0 }
  0x4f   :  { %370 = vmatpush3.bf16.msra.mxu1 %v369_v26 }
  0x50   :  { %371 = vmatprep.subr.bf16.mxu1 %v489_v0 }
  0x53   :  { %373 = vmatpush3.bf16.msra.mxu1 %v372_v29 }
  0x54   :  { %374 = vmatprep.subr.bf16.mxu1 %v489_v0 }
  0x57   :  { %376 = vmatpush3.bf16.msra.mxu1 %v375_v32 }
 0x114   :  { %v142_v34 = vpop.f32.mrb[0].mxu0 }
 0x115   :  { %v143_v35 = vadd.f32 %v276_v33, %v142_v34  ;;  %v311_v36 = vpop.f32.mrb[1].mxu0 }
 0x117   :  { %v146_v37 = vmax.f32 %v143_v35, 0.0 }
 0x119   :  { %345 = vmatmul.mubr.f32.vlgmr.msra.gmra.mrb[0].mxu1 %v146_v37 }
 0x1ec   :  { %v236_v39 = vpop.f32.mrb[0].mxu1 }
 0x1ed   :  { %v237_v40 = vadd.f32 %v278_v38, %v236_v39  ;;  %v346_v41 = vpop.f32.mrb[1].mxu1 }
 0x1ef   :  { %253 = vst [vmem:[#allocation8] sm:$0xff] %v237_v40  ;;  %v241_v42 = vsel %vm240_vm2, %v237_v40, -inf }
 0x1f0   :  { %242 = vmax.xlane.f32.xlu0 %v241_v42 }
 0x27d   :  { %v243_v43 = vpop.xlane.xlu0 %242 }
 0x27e   :  { %v244_v44 = vsub.f32 %v237_v40, %v243_v43 }
 0x280   :  { %v245_v45 = vmul.f32 1.442695, %v244_v44 }
 0x282   :  { %386 = vpow2.f32 %v245_v45 }
 0x28c   :  { %v387_v46 = vpop.eup %386 }
 0x28d   :  { %v247_v47 = vsel %vm240_vm2, %v387_v46, 0.0 }
 0x28e   :  { %248 = vadd.xlane.f32.xlu0 %v247_v47 }
 0x31b   :  { %v249_v48 = vpop.xlane.xlu0 %248 }
 0x31c   :  { %388 = vlog2.f32 %v249_v48 }
 0x326   :  { %v389_v49 = vpop.eup %388 }
 0x327   :  { %v251_v50 = vmul.f32 0.6931472, %v389_v49 }
 0x329   :  { %v252_v51 = vsub.f32 %v244_v44, %v251_v50 }
 0x32b   :  { %255 = vrot.lane.b32.xlu1 %v252_v51, %s486_s29 }
 0x39d   :  { %v256_v52 = vpop.permute.xlu1 %255 }
 0x39e   :  { %259 = vst.msk [vmem:[#allocation8] sm:$0xff] %vm258_vm3, %v256_v52 }
 0x39f   :  { %467 = shalt.err (!%p464_p0)
}
 0x3a0   :  { %s468_s11 = scalar_lea.hbm %s589_s5, 128 }
 0x3a1   :  { %p469_p1 = scmp.ne.s32.totalorder %s589_s5, %s468_s11  ;;  %p472_p2 = scmp.lt.u32.totalorder %s468_s11, %s589_s5 }
 0x3a3   :  { %p474_p3 = pnand %p472_p2, %p469_p1 }
 0x3a5   :  { %477 = shalt.err (!%p474_p3)
}
 0x3a6   :  { %269 = dma.vmem_to_hbm [thread:$0]  %s267_s4, 128, %s589_s5, [#allocation4]  }
 0x3a7   :  { %482 = dma.done.wait [#allocation4], 128  }
 0x3a8   :  { %483 = vsyncadd [#allocation4], 4294967168 }
 0x3a9   :  { %273 = vsyncpa [#allocation3], 1 }
 0x3aa   :  { %274 = vsyncpa [#allocation6], 1 }
 0x3ab   :  { %275 = vsyncpa [#allocation4], 1 }

</bundles_post_ra>
